<compile_context>
chip_gen: v5e
topology: v5e:2x2
jax: 0.10.0
libtpu: 0.0.40
codegen_flags: <defaults>
</compile_context>

<pallas_src>
import functools

import jax
import jax.numpy as jnp
from jax import lax
from jax.experimental import pallas as pl
from jax.experimental.pallas import tpu as pltpu

# module hyperparameters (from the PyTorch source)
N_EMBD = 64
NUM_HEADS = 4
HEAD_SIZE = N_EMBD // NUM_HEADS   # 16
BLOCK_SIZE = 256                  # causal buffer max length (T <= BLOCK_SIZE)
# dropout = 0.1 in the module; eval-mode forward -> identity.
# TODO(synk): dropout is a no-op here (inference semantics); training-mode
#             dropout would need pltpu.prng_* masking.


def _mha_kernel(x_ref, w_ref, mask_ref, bias_ref, o_ref, *, num_heads, head_size):
    # x_ref:    (Bb, T, C)        bf16 input block
    # w_ref:    (C, 2C + H*C)     bf16 packed [Wq*scale | Wk | Wv_h@Wp_h.T] weights
    # mask_ref: (T, T)            f32 additive causal mask (0 / -1e30)
    # bias_ref: (1, C)            f32 output-projection bias
    # o_ref:    (Bb, T, C)        f32 output block
    Bb, T, C = x_ref.shape
    H, HS = num_heads, head_size

    x2 = x_ref[...].reshape(Bb * T, C)                                   # bf16
    # One fused projection matmul: Q, K and proj-folded V of every head.
    qkv = jnp.dot(x2, w_ref[...], preferred_element_type=jnp.float32)    # (Bb*T, 2C+H*C)
    qkv = qkv.astype(jnp.bfloat16)

    mask = mask_ref[...]                                                  # (T, T) f32
    bias = bias_ref[0]                                                    # (C,)   f32

    for b in range(Bb):                                                   # static unroll
        r0 = b * T
        acc = None
        for h in range(H):                                                # static unroll
            q = qkv[r0:r0 + T, h * HS:(h + 1) * HS]                       # (T, HS), scale folded
            k = qkv[r0:r0 + T, C + h * HS:C + (h + 1) * HS]               # (T, HS)
            v = qkv[r0:r0 + T, 2 * C + h * C:2 * C + (h + 1) * C]         # (T, C), proj folded

            # scores = q @ k.T  (contract last dims; bf16 in, f32 accumulate)
            s = lax.dot_general(q, k, (((1,), (1,)), ((), ())),
                                preferred_element_type=jnp.float32)       # (T, T)
            s = s + mask
            m = jnp.max(s, axis=-1, keepdims=True)
            e = jnp.exp(s - m)                                            # in [0, 1]
            denom = jnp.sum(e, axis=-1, keepdims=True)                    # (T, 1), >= 1
            inv = pl.reciprocal(denom, approx=True)                       # EUP, ~free

            pv = jnp.dot(e.astype(jnp.bfloat16), v,
                         preferred_element_type=jnp.float32)              # (T, C)
            term = pv * inv                                               # normalize post-PV
            acc = term if acc is None else acc + term

        o_ref[b] = (acc + bias).astype(o_ref.dtype)


def _pick_batch_block(B):
    """Batch elements per grid step: amortize per-step overhead, but keep
    >= 2 grid steps when B > 1 so both v7x TensorCores get work."""
    b_blk = min(8, B)
    if B > 1:
        b_blk = min(b_blk, max(1, B // 2))
    while B % b_blk:
        b_blk -= 1
    return b_blk


def multi_head_attention(x, wq, wk, wv, wp, bp):
    """x: (B, T, C); wq/wk/wv: (H, C, HS) ("math" layout: y = x @ w);
    wp: (C, C) (PyTorch (out, in) layout: y = z @ wp.T + bp); bp: (C,)."""
    B, T, C = x.shape
    H, _, HS = wq.shape
    out_dtype = x.dtype
    scale = float(C) ** -0.5   # matches `C ** (-0.5)` in the PyTorch source (C = n_embd)

    # --- weight packing (done once, outside the kernel) ---
    # Q (scale folded in) and K: (C, H*HS), head h in columns [h*HS, (h+1)*HS)
    wq_p = jnp.transpose(wq * scale, (1, 0, 2)).reshape(C, H * HS)
    wk_p = jnp.transpose(wk, (1, 0, 2)).reshape(C, H * HS)
    # V with the output projection folded in: W'_h = Wv_h @ Wp[:, h*HS:(h+1)*HS].T
    wv_p = jnp.concatenate(
        [wv[h] @ wp[:, h * HS:(h + 1) * HS].T for h in range(H)], axis=1)  # (C, H*C)
    w_all = jnp.concatenate([wq_p, wk_p, wv_p], axis=1).astype(jnp.bfloat16)
    F = w_all.shape[1]   # 2*C + H*C

    # additive causal mask (large finite negative: NaN-safe vs -inf)
    tril = jnp.tril(jnp.ones((T, T), dtype=bool))
    mask_bias = jnp.where(tril, 0.0, -1e30).astype(jnp.float32)
    bias2 = bp.reshape(1, C).astype(jnp.float32)

    x_bf = x.astype(jnp.bfloat16)
    b_blk = _pick_batch_block(B)
    grid = (B // b_blk,)

    kernel = functools.partial(_mha_kernel, num_heads=H, head_size=HS)
    return pl.pallas_call(
        kernel,
        out_shape=jax.ShapeDtypeStruct((B, T, C), out_dtype),
        grid_spec=pltpu.PrefetchScalarGridSpec(
            num_scalar_prefetch=0,
            grid=grid,
            in_specs=[
                pl.BlockSpec((b_blk, T, C), lambda i: (i, 0, 0)),
                pl.BlockSpec((C, F), lambda i: (0, 0)),
                pl.BlockSpec((T, T), lambda i: (0, 0)),
                pl.BlockSpec((1, C), lambda i: (0, 0)),
            ],
            out_specs=pl.BlockSpec((b_blk, T, C), lambda i: (i, 0, 0)),
        ),
        compiler_params=pltpu.CompilerParams(
            dimension_semantics=("parallel",),
        ),
    )(x_bf, w_all, mask_bias, bias2)


def _reference(x, wq, wk, wv, wp, bp):
    """Pure-JAX f32 reference of the PyTorch forward (eval mode)."""
    B, T, C = x.shape
    scale = C ** -0.5
    mask = jnp.tril(jnp.ones((T, T), dtype=bool))
    outs = []
    for h in range(wq.shape[0]):
        q = x @ wq[h]
        k = x @ wk[h]
        v = x @ wv[h]
        wei = (q @ jnp.swapaxes(k, -2, -1)) * scale
        wei = jnp.where(mask[None], wei, -jnp.inf)
        wei = jax.nn.softmax(wei, axis=-1)
        outs.append(wei @ v)
    cat = jnp.concatenate(outs, axis=-1)
    return cat @ wp.T + bp


if __name__ == "__main__":
    key = jax.random.PRNGKey(0)
    B, T, C = 2, 8, N_EMBD
    H, HS = NUM_HEADS, HEAD_SIZE

    kx, kq, kk, kv, kwp, kbp = jax.random.split(key, 6)
    x = jax.random.normal(kx, (B, T, C), dtype=jnp.float32)
    # deterministic synthetic parameters (nn.Linear-like scale)
    wq = jax.random.normal(kq, (H, C, HS), dtype=jnp.float32) * (C ** -0.5)
    wk = jax.random.normal(kk, (H, C, HS), dtype=jnp.float32) * (C ** -0.5)
    wv = jax.random.normal(kv, (H, C, HS), dtype=jnp.float32) * (C ** -0.5)
    wp = jax.random.normal(kwp, (C, C), dtype=jnp.float32) * (C ** -0.5)
    bp = jax.random.normal(kbp, (C,), dtype=jnp.float32) * 0.01

    out = multi_head_attention(x, wq, wk, wv, wp, bp)
    out = jax.block_until_ready(out)

    ref = _reference(x, wq, wk, wv, wp, bp)
    assert out.shape == (B, T, C)
    # bf16 MXU inputs + approx reciprocal -> relaxed but tight-for-bf16 tolerance
    assert jnp.allclose(out, ref, atol=2e-2, rtol=2e-2), "mismatch vs reference"

    print("KERNEL_OK")
</pallas_src>

<mosaic_0001>
module attributes {stable_mosaic.version = 11 : i64} {
  func.func @_mha_kernel(%arg0: i32, %arg1: memref<1x8x64xbf16, #tpu.memory_space<vmem>>, %arg2: memref<64x384xbf16, #tpu.memory_space<vmem>>, %arg3: memref<8x8xf32, #tpu.memory_space<vmem>>, %arg4: memref<1x64xf32, #tpu.memory_space<vmem>>, %arg5: memref<1x8x64xf32, #tpu.memory_space<vmem>>) attributes {dimension_semantics = [#tpu.dimension_semantics<parallel>], iteration_bounds = array<i64: 2>, scalar_prefetch = 0 : i64, scratch_operands = 0 : i64, tpu.core_type = #tpu.core_type<tc>, window_params = [{transform_indices = @transform_0, window_bounds = array<i64: 1, 8, 64>}, {pipeline_mode = #tpu.pipeline_mode<synchronous>, transform_indices = @transform_1, window_bounds = array<i64: 64, 384>}, {pipeline_mode = #tpu.pipeline_mode<synchronous>, transform_indices = @transform_2, window_bounds = array<i64: 8, 8>}, {pipeline_mode = #tpu.pipeline_mode<synchronous>, transform_indices = @transform_3, window_bounds = array<i64: 1, 64>}, {transform_indices = @transform_4, window_bounds = array<i64: 1, 8, 64>}]} {
    %c0 = arith.constant 0 : index
    %c0_0 = arith.constant 0 : index
    %c0_1 = arith.constant 0 : index
    %0 = vector.load %arg1[%c0, %c0_0, %c0_1] : memref<1x8x64xbf16, #tpu.memory_space<vmem>>, vector<1x8x64xbf16>
    %1 = vector.shape_cast %0 : vector<1x8x64xbf16> to vector<8x64xbf16>
    %c0_2 = arith.constant 0 : index
    %c0_3 = arith.constant 0 : index
    %2 = vector.load %arg2[%c0_2, %c0_3] : memref<64x384xbf16, #tpu.memory_space<vmem>>, vector<64x384xbf16>
    %cst = arith.constant dense<0.000000e+00> : vector<8x384xf32>
    %3 = tpu.matmul %1, %2, %cst {dimension_numbers = #tpu.dot_dimension_numbers<[1], [0], [0], [1], [0, 0, 1, 1], [], []>} : vector<8x64xbf16>, vector<64x384xbf16>, vector<8x384xf32> -> vector<8x384xf32>
    %4 = arith.truncf %3 : vector<8x384xf32> to vector<8x384xbf16>
    %c0_4 = arith.constant 0 : index
    %c0_5 = arith.constant 0 : index
    %5 = vector.load %arg3[%c0_4, %c0_5] : memref<8x8xf32, #tpu.memory_space<vmem>>, vector<8x8xf32>
    %c0_6 = arith.constant 0 : index
    %c0_7 = arith.constant 0 : index
    %6 = vector.load %arg4[%c0_6, %c0_7] : memref<1x64xf32, #tpu.memory_space<vmem>>, vector<1x64xf32>
    %7 = vector.shape_cast %6 : vector<1x64xf32> to vector<64xf32>
    %8 = vector.extract_strided_slice %4 {offsets = [0, 0], sizes = [8, 16], strides = [1, 1]} : vector<8x384xbf16> to vector<8x16xbf16>
    %9 = vector.extract_strided_slice %4 {offsets = [0, 64], sizes = [8, 16], strides = [1, 1]} : vector<8x384xbf16> to vector<8x16xbf16>
    %10 = vector.extract_strided_slice %4 {offsets = [0, 128], sizes = [8, 64], strides = [1, 1]} : vector<8x384xbf16> to vector<8x64xbf16>
    %cst_8 = arith.constant dense<0.000000e+00> : vector<8x8xf32>
    %11 = tpu.matmul %8, %9, %cst_8 {dimension_numbers = #tpu.dot_dimension_numbers<[1], [1], [0], [0], [0, 0, 1, 0], [], []>} : vector<8x16xbf16>, vector<8x16xbf16>, vector<8x8xf32> -> vector<8x8xf32>
    %12 = arith.addf %11, %5 : vector<8x8xf32>
    %cst_9 = arith.constant dense<0xFF800000> : vector<8xf32>
    %13 = vector.multi_reduction <maximumf>, %12, %cst_9 [1] : vector<8x8xf32> to vector<8xf32>
    %14 = vector.shape_cast %13 : vector<8xf32> to vector<8x1xf32>
    %15 = vector.broadcast %14 : vector<8x1xf32> to vector<8x8xf32>
    %16 = arith.subf %12, %15 : vector<8x8xf32>
    %17 = math.exp %16 : vector<8x8xf32>
    %cst_10 = arith.constant dense<0.000000e+00> : vector<8xf32>
    %18 = vector.multi_reduction <add>, %17, %cst_10 [1] : vector<8x8xf32> to vector<8xf32>
    %19 = vector.shape_cast %18 : vector<8xf32> to vector<8x1xf32>
    %20 = tpu.reciprocal %19 {approx = true} : vector<8x1xf32> -> vector<8x1xf32>
    %21 = arith.truncf %17 : vector<8x8xf32> to vector<8x8xbf16>
    %cst_11 = arith.constant dense<0.000000e+00> : vector<8x64xf32>
    %22 = tpu.matmul %21, %10, %cst_11 {dimension_numbers = #tpu.dot_dimension_numbers<[1], [0], [0], [1], [0, 0, 1, 1], [], []>} : vector<8x8xbf16>, vector<8x64xbf16>, vector<8x64xf32> -> vector<8x64xf32>
    %23 = vector.broadcast %20 : vector<8x1xf32> to vector<8x64xf32>
    %24 = arith.mulf %22, %23 : vector<8x64xf32>
    %25 = vector.extract_strided_slice %4 {offsets = [0, 16], sizes = [8, 16], strides = [1, 1]} : vector<8x384xbf16> to vector<8x16xbf16>
    %26 = vector.extract_strided_slice %4 {offsets = [0, 80], sizes = [8, 16], strides = [1, 1]} : vector<8x384xbf16> to vector<8x16xbf16>
    %27 = vector.extract_strided_slice %4 {offsets = [0, 192], sizes = [8, 64], strides = [1, 1]} : vector<8x384xbf16> to vector<8x64xbf16>
    %cst_12 = arith.constant dense<0.000000e+00> : vector<8x8xf32>
    %28 = tpu.matmul %25, %26, %cst_12 {dimension_numbers = #tpu.dot_dimension_numbers<[1], [1], [0], [0], [0, 0, 1, 0], [], []>} : vector<8x16xbf16>, vector<8x16xbf16>, vector<8x8xf32> -> vector<8x8xf32>
    %29 = arith.addf %28, %5 : vector<8x8xf32>
    %cst_13 = arith.constant dense<0xFF800000> : vector<8xf32>
    %30 = vector.multi_reduction <maximumf>, %29, %cst_13 [1] : vector<8x8xf32> to vector<8xf32>
    %31 = vector.shape_cast %30 : vector<8xf32> to vector<8x1xf32>
    %32 = vector.broadcast %31 : vector<8x1xf32> to vector<8x8xf32>
    %33 = arith.subf %29, %32 : vector<8x8xf32>
    %34 = math.exp %33 : vector<8x8xf32>
    %cst_14 = arith.constant dense<0.000000e+00> : vector<8xf32>
    %35 = vector.multi_reduction <add>, %34, %cst_14 [1] : vector<8x8xf32> to vector<8xf32>
    %36 = vector.shape_cast %35 : vector<8xf32> to vector<8x1xf32>
    %37 = tpu.reciprocal %36 {approx = true} : vector<8x1xf32> -> vector<8x1xf32>
    %38 = arith.truncf %34 : vector<8x8xf32> to vector<8x8xbf16>
    %cst_15 = arith.constant dense<0.000000e+00> : vector<8x64xf32>
    %39 = tpu.matmul %38, %27, %cst_15 {dimension_numbers = #tpu.dot_dimension_numbers<[1], [0], [0], [1], [0, 0, 1, 1], [], []>} : vector<8x8xbf16>, vector<8x64xbf16>, vector<8x64xf32> -> vector<8x64xf32>
    %40 = vector.broadcast %37 : vector<8x1xf32> to vector<8x64xf32>
    %41 = arith.mulf %39, %40 : vector<8x64xf32>
    %42 = arith.addf %24, %41 : vector<8x64xf32>
    %43 = vector.extract_strided_slice %4 {offsets = [0, 32], sizes = [8, 16], strides = [1, 1]} : vector<8x384xbf16> to vector<8x16xbf16>
    %44 = vector.extract_strided_slice %4 {offsets = [0, 96], sizes = [8, 16], strides = [1, 1]} : vector<8x384xbf16> to vector<8x16xbf16>
    %45 = vector.extract_strided_slice %4 {offsets = [0, 256], sizes = [8, 64], strides = [1, 1]} : vector<8x384xbf16> to vector<8x64xbf16>
    %cst_16 = arith.constant dense<0.000000e+00> : vector<8x8xf32>
    %46 = tpu.matmul %43, %44, %cst_16 {dimension_numbers = #tpu.dot_dimension_numbers<[1], [1], [0], [0], [0, 0, 1, 0], [], []>} : vector<8x16xbf16>, vector<8x16xbf16>, vector<8x8xf32> -> vector<8x8xf32>
    %47 = arith.addf %46, %5 : vector<8x8xf32>
    %cst_17 = arith.constant dense<0xFF800000> : vector<8xf32>
    %48 = vector.multi_reduction <maximumf>, %47, %cst_17 [1] : vector<8x8xf32> to vector<8xf32>
    %49 = vector.shape_cast %48 : vector<8xf32> to vector<8x1xf32>
    %50 = vector.broadcast %49 : vector<8x1xf32> to vector<8x8xf32>
    %51 = arith.subf %47, %50 : vector<8x8xf32>
    %52 = math.exp %51 : vector<8x8xf32>
    %cst_18 = arith.constant dense<0.000000e+00> : vector<8xf32>
    %53 = vector.multi_reduction <add>, %52, %cst_18 [1] : vector<8x8xf32> to vector<8xf32>
    %54 = vector.shape_cast %53 : vector<8xf32> to vector<8x1xf32>
    %55 = tpu.reciprocal %54 {approx = true} : vector<8x1xf32> -> vector<8x1xf32>
    %56 = arith.truncf %52 : vector<8x8xf32> to vector<8x8xbf16>
    %cst_19 = arith.constant dense<0.000000e+00> : vector<8x64xf32>
    %57 = tpu.matmul %56, %45, %cst_19 {dimension_numbers = #tpu.dot_dimension_numbers<[1], [0], [0], [1], [0, 0, 1, 1], [], []>} : vector<8x8xbf16>, vector<8x64xbf16>, vector<8x64xf32> -> vector<8x64xf32>
    %58 = vector.broadcast %55 : vector<8x1xf32> to vector<8x64xf32>
    %59 = arith.mulf %57, %58 : vector<8x64xf32>
    %60 = arith.addf %42, %59 : vector<8x64xf32>
    %61 = vector.extract_strided_slice %4 {offsets = [0, 48], sizes = [8, 16], strides = [1, 1]} : vector<8x384xbf16> to vector<8x16xbf16>
    %62 = vector.extract_strided_slice %4 {offsets = [0, 112], sizes = [8, 16], strides = [1, 1]} : vector<8x384xbf16> to vector<8x16xbf16>
    %63 = vector.extract_strided_slice %4 {offsets = [0, 320], sizes = [8, 64], strides = [1, 1]} : vector<8x384xbf16> to vector<8x64xbf16>
    %cst_20 = arith.constant dense<0.000000e+00> : vector<8x8xf32>
    %64 = tpu.matmul %61, %62, %cst_20 {dimension_numbers = #tpu.dot_dimension_numbers<[1], [1], [0], [0], [0, 0, 1, 0], [], []>} : vector<8x16xbf16>, vector<8x16xbf16>, vector<8x8xf32> -> vector<8x8xf32>
    %65 = arith.addf %64, %5 : vector<8x8xf32>
    %cst_21 = arith.constant dense<0xFF800000> : vector<8xf32>
    %66 = vector.multi_reduction <maximumf>, %65, %cst_21 [1] : vector<8x8xf32> to vector<8xf32>
    %67 = vector.shape_cast %66 : vector<8xf32> to vector<8x1xf32>
    %68 = vector.broadcast %67 : vector<8x1xf32> to vector<8x8xf32>
    %69 = arith.subf %65, %68 : vector<8x8xf32>
    %70 = math.exp %69 : vector<8x8xf32>
    %cst_22 = arith.constant dense<0.000000e+00> : vector<8xf32>
    %71 = vector.multi_reduction <add>, %70, %cst_22 [1] : vector<8x8xf32> to vector<8xf32>
    %72 = vector.shape_cast %71 : vector<8xf32> to vector<8x1xf32>
    %73 = tpu.reciprocal %72 {approx = true} : vector<8x1xf32> -> vector<8x1xf32>
    %74 = arith.truncf %70 : vector<8x8xf32> to vector<8x8xbf16>
    %cst_23 = arith.constant dense<0.000000e+00> : vector<8x64xf32>
    %75 = tpu.matmul %74, %63, %cst_23 {dimension_numbers = #tpu.dot_dimension_numbers<[1], [0], [0], [1], [0, 0, 1, 1], [], []>} : vector<8x8xbf16>, vector<8x64xbf16>, vector<8x64xf32> -> vector<8x64xf32>
    %76 = vector.broadcast %73 : vector<8x1xf32> to vector<8x64xf32>
    %77 = arith.mulf %75, %76 : vector<8x64xf32>
    %78 = arith.addf %60, %77 : vector<8x64xf32>
    %79 = vector.shape_cast %7 : vector<64xf32> to vector<1x64xf32>
    %80 = vector.broadcast %79 : vector<1x64xf32> to vector<8x64xf32>
    %81 = arith.addf %78, %80 : vector<8x64xf32>
    %c0_24 = arith.constant 0 : index
    %c0_25 = arith.constant 0 : index
    %c0_26 = arith.constant 0 : index
    %82 = vector.load %arg5[%c0_24, %c0_25, %c0_26] : memref<1x8x64xf32, #tpu.memory_space<vmem>>, vector<1x8x64xf32>
    %83 = vector.shape_cast %82 : vector<1x8x64xf32> to vector<8x64xf32>
    %84 = vector.shape_cast %81 : vector<8x64xf32> to vector<1x8x64xf32>
    tpu.vector_store %arg5[%c0_24, %c0_25, %c0_26], %84 {strides = array<i32>} : memref<1x8x64xf32, #tpu.memory_space<vmem>>, vector<1x8x64xf32>,
    return
  }
  func.func @transform_0(%arg0: i32) -> (i32, i32, i32) {
    %c0_i32 = arith.constant 0 : i32
    %c0_i32_0 = arith.constant 0 : i32
    %c0_i32_1 = arith.constant 0 : i32
    return %arg0, %c0_i32, %c0_i32_0 : i32, i32, i32
  }
  func.func @transform_1(%arg0: i32) -> (i32, i32) {
    %c0_i32 = arith.constant 0 : i32
    %c0_i32_0 = arith.constant 0 : i32
    %c0_i32_1 = arith.constant 0 : i32
    return %c0_i32, %c0_i32_0 : i32, i32
  }
  func.func @transform_2(%arg0: i32) -> (i32, i32) {
    %c0_i32 = arith.constant 0 : i32
    %c0_i32_0 = arith.constant 0 : i32
    %c0_i32_1 = arith.constant 0 : i32
    return %c0_i32, %c0_i32_0 : i32, i32
  }
  func.func @transform_3(%arg0: i32) -> (i32, i32) {
    %c0_i32 = arith.constant 0 : i32
    %c0_i32_0 = arith.constant 0 : i32
    %c0_i32_1 = arith.constant 0 : i32
    return %c0_i32, %c0_i32_0 : i32, i32
  }
  func.func @transform_4(%arg0: i32) -> (i32, i32, i32) {
    %c0_i32 = arith.constant 0 : i32
    %c0_i32_0 = arith.constant 0 : i32
    %c0_i32_1 = arith.constant 0 : i32
    return %arg0, %c0_i32, %c0_i32_0 : i32, i32, i32
  }
}

</mosaic_0001>

<bundles_post_ra>
// kernel: tpu_custom_call.1
= control target key start
LH: loop header
LB: loop body
LE: loop exit
PB: predicated region body
PF: predicated region fallthrough
CT: control target
= control target key end

     0   :  { %9 = vsyncpa [#allocation3], 0  ;;  %s1278_s0 = inlined_call_operand.hbm [shape: bf16[2,8,64], index: 0, kind: input, shape index: {}]   ;;  %s1279_s1 = inlined_call_operand.hbm [shape: bf16[64,384], index: 1, kind: input, shape index: {}]   ;;  %s1280_s2 = inlined_call_operand.hbm [shape: f32[8,8], index: 2, kind: input, shape index: {}]   ;;  %s1281_s3 = inlined_call_operand.vmem [shape: f32[1,64], index: 3, kind: input, shape index: {}]   ;;  %s1282_s4 = inlined_call_operand.hbm [shape: f32[2,8,64], index: 4, kind: output, shape index: {}]  }
   0x1   :  { %11 = vsyncpa [#allocation3 + $0x1], 0 }
   0x2   :  { %12 = vsyncpa [#allocation6], 0 }
   0x3   :  { %13 = vsyncpa [#allocation4], 0 }
   0x4   :  { %15 = vsyncpa [#allocation4 + $0x1], 0  ;;  %s1095_s15 = smov 0   ;;  %s1097_s16 = smov 0  }
   0x5   :  { %s1099_s17 = smov 0   ;;  %s1101_s18 = smov 0  }
   0x6 LB: > { %s152_s21 = sshll.u32 %s1279_s1, 4  ;;  %s1119_s22 = sadd.s32 4294967295, %s1057_s18   ;;  %s1057_s18 = sphi %s1101_s18, %s1293_s18   ;;  %s1053_s17 = sphi %s1099_s17, %s1292_s17   ;;  %s1049_s16 = sphi %s1097_s16, %s1291_s16   ;;  %s1045_s15 = sphi %s1095_s15, %s1290_s15   ;;  %s153_s21 = int_to_ptr.hbm [resolvable:$true] %s152_s21 }
   0x7   : > { %p718_p0 = scmp.ge.s32.totalorder %s1057_s18, 1  ;;  %p42_p1 = scmp.eq.s32.totalorder %s1119_s22, 0 }
   0x8   : > { %p141_p2 = scmp.lt.s32.totalorder %s1057_s18, 3  ;;  %s1059_s24 = smov [#allocation5]  }
   0x9   : > { %s154_s25 = sshll.u32 %s1059_s24, 4  ;;  %s167_s28 = sshll.u32 %s1280_s2, 4  ;;  %s155_s25 = int_to_ptr.vmem [resolvable:$true] %s154_s25  ;;  %s168_s28 = int_to_ptr.hbm [resolvable:$true] %s167_s28 }
   0xa   : > { %p1124_p3 = pnand %p718_p0, %p141_p2  ;;  %s1060_s29 = smov [#allocation7]  }
   0xb   : > { %s169_s30 = sshll.u32 %s1060_s29, 4  ;;  %s1061_s5 = smov 192   ;;  %s170_s30 = int_to_ptr.vmem [resolvable:$true] %s169_s30 }
   0xc   : > { %p816_p4 = pneg %p1124_p3  ;;  %s1062_s6 = smov 12  }
   0xd   : > { %s717_s7 = sadd.s32 4294967294, %s1057_s18   ;;  %s1138_s8 = sadd.s32 1, %s1057_s18  }
   0xe   : > { %p817_p6 = pnand %p816_p4, %p42_p1  ;;  %s25_s9 = ssub.s32 %s1057_s18, %s1138_s8 }
   0xf   : > { %s28_s10 = sadd.s32 1, %s1053_s17  ;;  %p26_p7 = scmp.eq.s32.totalorder %s25_s9, 0 }
  0x10   : > { %819 = dma.hbm_to_vmem [thread:$0]  (!%p817_p6), %s153_s21, 1536, %s155_s25, [#allocation6], %s1061_s5, %s1061_s5, %s1062_s6  }
  0x11   : > { %822 = dma.hbm_to_vmem [thread:$0]  (!%p817_p6), %s168_s28, 128, %s170_s30, [#allocation6]  }
  0x12   : > { %p35_p8 = scmp.ne.s32.totalorder %s1053_s17, %s1049_s16  ;;  %p36_p9 = scmp.eq.s32.totalorder %s1057_s18, 0 }
  0x13   : > { %p41_p10 = scmp.ne.s32.totalorder %s1049_s16, %s1045_s15  ;;  %p128_p13 = scmp.eq.s32.totalorder %s1119_s22, 1 }
  0x14   : > { %s1149_s11 = scalar_select %p26_p7, %s1053_s17, %s28_s10  }
  0x15   : > { %p1151_p11 = por %p36_p9, %p35_p8  ;;  %p1157_p12 = por %p42_p1, %p41_p10 }
  0x16   : > { %p134_p0 = scmp.eq.s32.totalorder %s717_s7, 1  ;;  %p833_p2 = scmp.lt.s32.totalorder %s1057_s18, 2 }
  0x17   : > { %s183_s14 = sand.u32 1, %s1053_s17   ;;  %p1164_p4 = por %p128_p13, %p35_p8 }
  0x18   : > { %p1168_p6 = por %p134_p0, %p41_p10  ;;  %s722_s21 = sshll.u32 %s183_s14, 2 }
  0x19   : > { %s723_s24 = sshll.u32 %s1057_s18, 2  ;;  %s187_s28 = scalar_lea.vmem [#allocation2], %s722_s21 }
  0x1a   : > { %s191_s27 = scalar_lea.hbm %s1278_s0, %s723_s24  ;;  %s195_s29 = sshll.u32 %s187_s28, 4  ;;  %s196_s29 = int_to_ptr.vmem [resolvable:$true] %s195_s29 }
  0x1b   : > { %s193_s30 = sshll.u32 %s191_s27, 4  ;;  %p1178_p7 = pnand %p833_p2, %p1151_p11  ;;  %s194_s30 = int_to_ptr.hbm [resolvable:$true] %s193_s30 }
  0x1c   : > { %s184_s6 = scalar_lea.sflag [#allocation3], %s183_s14  ;;  %s957_s7 = sshra.s32 %s194_s30, 4  ;;  %s958_s7 = int_to_ptr.hbm [resolvable:$true] %s957_s7 }
  0x1d   : > { %s959_s9 = scalar_lea.hbm %s958_s7, 4  ;;  %p961_p9 = pneg %p1178_p7 }
  0x1e   : > { %p960_p8 = scmp.ne.s32.totalorder %s958_s7, %s959_s9  ;;  %s964_s24 = scalar_lea.hbm %s1278_s0, 8 }
  0x1f   : > { %p965_p11 = scmp.lt.s32.totalorder %s958_s7, %s1278_s0  ;;  %p966_p0 = scmp.lt.s32.totalorder %s964_s24, %s959_s9 }
  0x20   : > { %p962_p10 = pnand %p961_p9, %p960_p8 }
  0x21   : > { %p967_p2 = por %p966_p0, %p965_p11 }
  0x22   : > { %p963_p13 = pneg %p962_p10 }
  0x24   : > { %p968_p5 = pnand %p967_p2, %p963_p13 }
  0x26   : > { %971 = shalt.err (!%p968_p5)
}
  0x27   : > { %826 = dma.hbm_to_vmem [thread:$0]  (!%p1178_p7), %s194_s30, 64, %s196_s29, %s184_s6  }
  0x28   : > { %204 = sbr.rel (%p1124_p3) target bundleno = 746 (0x2ea), region = 36  ;;  %s1195_s14 = sand.u32 (!%p1124_p3), 1, %s1049_s16  }
  0x29   : > { %s725_s26 = sshll.u32 (!%p1124_p3), %s1195_s14, 2  ;;  %s207_s27 = scalar_lea.sflag (!%p1124_p3), [#allocation3], %s1195_s14 }
  0x2a   : > { %s1199_s28 = scalar_lea.vmem (!%p1124_p3), [#allocation2], %s725_s26 }
  0x2d   : > { %1032 = dma.done.wait (%p1157_p12), %s207_s27, 64  }
  0x2e   : > { %1034 = vsyncadd (%p1157_p12), %s207_s27, 4294967232 }
  0x2f   : > { %1036 = dma.done.wait (%p42_p1), [#allocation6], 1664  }
  0x30   : > { %1038 = vsyncadd (%p42_p1), [#allocation6], 4294965632  ;;  %v767_v0 = vld [vmem:[#allocation5 + $0x48] sm:$0xf]  ;;  %v802_v1 = vld [vmem:[#allocation5 + $0x50] sm:$0xf0] }
  0x31   : > { %v801_v2 = vld [vmem:[#allocation5 + $0x4c] sm:$0xf]  ;;  %v768_v3 = vor.u32 %v802_v1, %v767_v0  ;;  %v769_v4 = vld [vmem:[#allocation5 + $0x54] sm:$0xf0]  ;;  %v755_v5 = vld [vmem:[#allocation5 + $0x30] sm:$0xf] }
  0x32   : > { %v799_v6 = vld [vmem:[#allocation5 + $0x38] sm:$0xf0]  ;;  %v772_v7 = vor.u32 %v801_v2, %v769_v4  ;;  %v798_v8 = vld [vmem:[#allocation5 + $0x34] sm:$0xf]  ;;  %v757_v9 = vld [vmem:[#allocation5 + $0x3c] sm:$0xf0] }
  0x33   : > { %336 = vmatpush.bf16.msra.mxu0 %v768_v3  ;;  %v756_v10 = vor.u32 %v799_v6, %v755_v5  ;;  %v760_v11 = vor.u32 %v798_v8, %v757_v9  ;;  %v743_v12 = vld [vmem:[#allocation5 + $0x18] sm:$0xf]  ;;  %v796_v13 = vld [vmem:[#allocation5 + $0x20] sm:$0xf0]  ;;  %v795_v14 = vld [vmem:[#allocation5 + $0x1c] sm:$0xf] }
  0x34   : > { %349 = vmatpush.bf16.msra.mxu1 %v772_v7  ;;  %v745_v15 = vld [vmem:[#allocation5 + $0x24] sm:$0xf0]  ;;  %v744_v16 = vor.u32 %v796_v13, %v743_v12  ;;  %v731_v18 = vld [vmem:[#allocation5] sm:$0xf]  ;;  %v793_v19 = vld [vmem:[#allocation5 + $0x8] sm:$0xf0] }
  0x35   : > { %v748_v17 = vor.u32 %v795_v14, %v745_v15  ;;  %v792_v20 = vld [vmem:[#allocation5 + $0x4] sm:$0xf]  ;;  %v733_v21 = vld [vmem:[#allocation5 + $0xc] sm:$0xf0]  ;;  %v732_v22 = vor.u32 %v793_v19, %v731_v18  ;;  %v247_v24 = vld [vmem:[%s1199_s28] sm:$0xf] }
  0x36   : > { %v736_v23 = vor.u32 %v792_v20, %v733_v21  ;;  %vm328_vm0 = vcmask 523264   ;;  %s1063_s23 = smov 96   ;;  %s1064_s13 = smov 32   ;;  %v775_v32 = vld [vmem:[#allocation5 + $0x50] sm:$0xf]  ;;  %vm380_vm1 = vcmask 130048  }
  0x37   : > { %337 = vmatpush.bf16.msra.mxu0 %v756_v10  ;;  %s1065_s29 = smov 64   ;;  %s1066_s30 = smov 16   ;;  %v803_v33 = vld [vmem:[#allocation5 + $0x58] sm:$0xf0]  ;;  %v763_v34 = vld [vmem:[#allocation5 + $0x38] sm:$0xf] }
  0x38   : > { %350 = vmatpush.bf16.msra.mxu1 %v760_v11  ;;  %s1067_s5 = smov 112   ;;  %s1068_s6 = smov 48   ;;  %v776_v35 = vor.u32 %v803_v33, %v775_v32  ;;  %v800_v36 = vld [vmem:[#allocation5 + $0x40] sm:$0xf0]  ;;  %v751_v38 = vld [vmem:[#allocation5 + $0x20] sm:$0xf] }
  0x39   : > { %s1069_s7 = smov 80   ;;  %v764_v37 = vor.u32 %v800_v36, %v763_v34  ;;  %v797_v39 = vld [vmem:[#allocation5 + $0x28] sm:$0xf0]  ;;  %v739_v41 = vld [vmem:[#allocation5 + $0x8] sm:$0xf]  ;;  %vm417_vm2 = vcmask 1043456  }
  0x3a   : > { %362 = vmatpush.bf16.msra.mxu2 %v776_v35  ;;  %v752_v40 = vor.u32 %v797_v39, %v751_v38  ;;  %v794_v42 = vld [vmem:[#allocation5 + $0x10] sm:$0xf0]  ;;  %v373_v62 = vld [vmem:[#allocation7] sm:$0xff]  ;;  %vm400_vm3 = vcmask 64512   ;;  %s728_s9 = sshll.u32 %s1195_s14, 3  ;;  %s789_s10 = sshll.u32 %s1119_s22, 3 }
  0x3b   : > { %338 = vmatpush.bf16.msra.mxu0 %v744_v16  ;;  %v740_v43 = vor.u32 %v794_v42, %v739_v41  ;;  %s623_s25 = scalar_lea.hbm %s1282_s4, %s789_s10  ;;  %s245_s22 = scalar_lea.vmem [#allocation8], %s728_s9 }
  0x3c   : > { %351 = vmatpush.bf16.msra.mxu1 %v748_v17  ;;  %s625_s27 = sshll.u32 %s245_s22, 4  ;;  %s627_s28 = sshll.u32 %s623_s25, 4  ;;  %s626_s27 = int_to_ptr.vmem [resolvable:$true] %s625_s27  ;;  %s628_s28 = int_to_ptr.hbm [resolvable:$true] %s627_s28 }
  0x3e   : > { %363 = vmatpush.bf16.msra.mxu2 %v764_v37 }
  0x3f   : > { %339 = vmatpush.bf16.msra.mxu0 %v732_v22 }
  0x40   : > { %352 = vmatpush.bf16.msra.mxu1 %v736_v23 }
  0x42   : > { %777 = vmatmul.msk.bf16.vlgmr.msra.gmra.mxu0 %vm328_vm0, %v247_v24  ;;  %364 = vmatpush.bf16.msra.mxu2 %v752_v40 }
  0x43   : > { %778 = vmatmul.msk.bf16.vlgmr.msra.gmra.mxu1 %vm328_vm0, %v247_v24 }
  0x46   : > { %365 = vmatpush.bf16.msra.mxu2 %v740_v43 }
  0x49   : > { %779 = vmatmul.msk.bf16.vlgmr.msra.gmra.mxu2 %vm328_vm0, %v247_v24 }
  0xbf   : > { %v341_v25 = vpop.f32.mrf.mxu0 }
  0xc0   : > { %v354_v26 = vpop.f32.mrf.mxu1 }
  0xc1   : > { %v371_v27 = vpack.c.bf16 %v354_v26, %v341_v25 }
  0xc3   : > { %v376_v28 = vunpack.c.l.b16 %v371_v27  ;;  %v412_v44 = vunpack.c.h.b16 %v371_v27 }
  0xc5   : > { %v377_v29 = vpack.c.b16 %v376_v28, %v376_v28  ;;  %v413_v46 = vpack.c.b16 %v412_v44, %v412_v44 }
  0xc7   : > { %492 = vrot.lane.b32.xlu2 %v377_v29, %s1063_s23  ;;  %494 = vrot.lane.b32.xlu1 %v377_v29, %s1064_s13  ;;  %v343_v30 = vpop.f32.mrf.mxu0  ;;  %v419_v51 = vsel %vm417_vm2, %v413_v46, 0  ;;  %s613_s23 = scalar_lea.sflag [#allocation4], %s1195_s14  ;;  %s1001_s13 = sshra.s32 %s628_s28, 4  ;;  %s1002_s13 = int_to_ptr.hbm [resolvable:$true] %s1001_s13 }
  0xc8   : > { %378 = vrot.lane.b32.xlu0 %v377_v29, %s1065_s29  ;;  %v356_v31 = vpop.f32.mrf.mxu1  ;;  %p1008_p12 = scmp.lt.s32.totalorder %s1002_s13, %s1282_s4 }
  0xcc   : > { %v367_v58 = vpop.f32.mrf.mxu2 }
  0xcd   : > { %v372_v59 = vpack.c.bf16 %v367_v58, %v367_v58 }
  0xcf   : > { %549 = vrot.lane.b32.xlu2 %v377_v29, %s1066_s30  ;;  %435 = vrot.lane.b32.xlu1 %v377_v29, %s1067_s5  ;;  %v530_v60 = vsel %vm417_vm2, %v372_v59, 0  ;;  %v582_v11 = vunpack.c.l.b16 %v372_v59 }
  0xd0   : > { %437 = vrot.lane.b32.xlu0 %v377_v29, %s1068_s6  ;;  %s1007_s6 = scalar_lea.hbm %s1282_s4, 16 }
  0xd1   : > { %v583_v14 = vpack.c.b16 %v582_v11, %v582_v11 }
  0xd4   : > { %v369_v61 = vpop.f32.mrf.mxu2 }
  0xd8   : > { %547 = vrot.lane.b32.xlu0 %v377_v29, %s1069_s7 }
 0x121   : > { %v493_v45 = vpop.permute.xlu2 %492 }
 0x129   : > { %v550_v52 = vpop.permute.xlu2 %549 }
 0x12a   : > { %v555_v55 = vsel %vm380_vm1, %v550_v52, 0 }
 0x139   : > { %v495_v47 = vpop.permute.xlu1 %494 }
 0x13a   : > { %v379_v48 = vpop.permute.xlu0 %378  ;;  %v500_v49 = vsel %vm380_vm1, %v495_v47, 0 }
 0x13b   : > { %v385_v50 = vsel %vm380_vm1, %v379_v48, 0  ;;  %509 = vmatpush.bf16.xpose.msrb.mxu2 %v500_v49 }
 0x13c   : > { %394 = vmatpush.bf16.xpose.msra.mxu3 %v385_v50 }
 0x141   : > { %v436_v56 = vpop.permute.xlu1 %435 }
 0x142   : > { %v438_v53 = vpop.permute.xlu0 %437  ;;  %784 = vmatmul.msk.bf16.vlgmr.msrb.gmra.mxu2 %vm380_vm1, %v493_v45 }
 0x143   : > { %780 = vmatmul.msk.bf16.vlgmr.msra.gmra.mxu3 %vm380_vm1, %v371_v27  ;;  %v443_v54 = vsel %vm380_vm1, %v438_v53, 0 }
 0x144   : > { %428 = vmatpush.bf16.msrb.mxu3 %v419_v51  ;;  %452 = vmatpush.bf16.xpose.msrb.mxu0 %v443_v54 }
 0x148   : > { %539 = vmatpush.bf16.msra.mxu3 %v530_v60 }
 0x14a   : > { %v548_v57 = vpop.permute.xlu0 %547 }
 0x14b   : > { %782 = vmatmul.msk.bf16.vlgmr.msrb.gmra.mxu0 %vm380_vm1, %v436_v56 }
 0x14c   : > { %564 = vmatpush.bf16.xpose.msra.mxu0 %v555_v55 }
 0x15b   : > { %786 = vmatmul.msk.bf16.vlgmr.msra.gmra.mxu0 %vm380_vm1, %v548_v57 }
 0x1c5   : > { %v511_v63 = vpop.f32.mrf.mxu2 }
 0x1c6   : > { %v396_v0 = vpop.f32.mrf.mxu3  ;;  %v512_v1 = vadd.f32 %v511_v63, %v373_v62 }
 0x1c7   : > { %v397_v2 = vadd.f32 %v396_v0, %v373_v62 }
 0x1c8   : > { %v454_v3 = vpop.f32.mrf.mxu0  ;;  %v515_v4 = vsel %vm400_vm3, %v512_v1, -inf }
 0x1c9   : > { %v455_v5 = vadd.f32 %v454_v3, %v373_v62  ;;  %516 = vmax.xlane.f32.xlu0 %v515_v4  ;;  %v401_v6 = vsel %vm400_vm3, %v397_v2, -inf }
 0x1ca   : > { %402 = vmax.xlane.f32.xlu1 %v401_v6 }
 0x1cb   : > { %v458_v7 = vsel %vm400_vm3, %v455_v5, -inf }
 0x1cc   : > { %459 = vmax.xlane.f32.xlu2 %v458_v7 }
 0x1cd   : > { %v513_v8 = vpop.f32.mrf.mxu2 }
 0x1ce   : > { %v398_v9 = vpop.f32.mrf.mxu3 }
 0x1d0   : > { %v456_v10 = vpop.f32.mrf.mxu0 }
 0x1d8   : > { %v566_v12 = vpop.f32.mrf.mxu0 }
 0x1d9   : > { %v567_v13 = vadd.f32 %v566_v12, %v373_v62 }
 0x1db   : > { %v570_v15 = vsel %vm400_vm3, %v567_v13, -inf }
 0x1dc   : > { %571 = vmax.xlane.f32.xlu1 %v570_v15 }
 0x1dd   : > { %584 = vrot.lane.b32.xlu0 %v583_v14, %s1065_s29 }
 0x1e0   : > { %v568_v16 = vpop.f32.mrf.mxu0 }
 0x1e4   : > { %469 = vrot.lane.b32.xlu2 %v413_v46, %s1065_s29  ;;  %s1003_s29 = scalar_lea.hbm %s1002_s13, 8 }
 0x1e5   : > { %p1004_p1 = scmp.ne.s32.totalorder %s1002_s13, %s1003_s29  ;;  %p1009_p7 = scmp.lt.s32.totalorder %s1007_s6, %s1003_s29 }
 0x1e7   : > { %p1005_p3 = pnand %p1004_p1, %p1164_p4  ;;  %p1010_p8 = por %p1009_p7, %p1008_p12 }
 0x1e9   : > { %p1006_p5 = pneg %p1005_p3 }
 0x1eb   : > { %p1011_p9 = pnand %p1010_p8, %p1006_p5 }
 0x23c   : > { %v517_v17 = vpop.xlane.xlu0 %516 }
 0x23d   : > { %v403_v18 = vpop.xlane.xlu1 %402  ;;  %v518_v19 = vsub.f32 %v512_v1, %v517_v17  ;;  %v880_v1 = vld [vmem:[%s1281_s3] ss:$0 sm:$0xff] }
 0x23e   : > { %v404_v20 = vsub.f32 %v397_v2, %v403_v18 }
 0x23f   : > { %v519_v21 = vmul.f32 1.442695, %v518_v19  ;;  %v460_v22 = vpop.xlane.xlu2 %459 }
 0x240   : > { %v405_v23 = vmul.f32 1.442695, %v404_v20  ;;  %v461_v24 = vsub.f32 %v455_v5, %v460_v22 }
 0x241   : > { %881 = vpow2.f32 %v519_v21 }
 0x242   : > { %883 = vpow2.f32 %v405_v23  ;;  %v462_v25 = vmul.f32 1.442695, %v461_v24 }
 0x244   : > { %885 = vpow2.f32 %v462_v25 }
 0x247   : > { %v882_v26 = vpop.eup %881  ;;  %v470_v27 = vpop.permute.xlu2 %469 }
 0x248   : > { %v884_v28 = vpop.eup %883  ;;  %v475_v29 = vsel %vm417_vm2, %v470_v27, 0  ;;  %v521_v30 = vsel %vm400_vm3, %v882_v26, 0.0  ;;  %v525_v41 = vpack.c.bf16 %v882_v26, %v882_v26 }
 0x249   : > { %484 = vmatpush.bf16.msrb.mxu1 %v475_v29  ;;  %522 = vadd.xlane.f32.xlu2 %v521_v30  ;;  %v411_v31 = vpack.c.bf16 %v884_v28, %v884_v28  ;;  %v407_v40 = vsel %vm400_vm3, %v884_v28, 0.0 }
 0x24a   : > { %v886_v32 = vpop.eup %885 }
 0x24b   : > { %781 = vmatmul.msk.bf16.vlgmr.msrb.gmra.mxu3 %vm400_vm3, %v411_v31  ;;  %v464_v33 = vsel %vm400_vm3, %v886_v32, 0.0  ;;  %v468_v34 = vpack.c.bf16 %v886_v32, %v886_v32 }
 0x24c   : > { %465 = vadd.xlane.f32.xlu1 %v464_v33 }
 0x24d   : > { %783 = vmatmul.msk.bf16.vlgmr.msrb.gmra.mxu1 %vm400_vm3, %v468_v34 }
 0x24f   : > { %v572_v35 = vpop.xlane.xlu1 %571  ;;  %v585_v36 = vpop.permute.xlu0 %584 }
 0x250   : > { %v573_v37 = vsub.f32 %v567_v13, %v572_v35  ;;  %v590_v38 = vsel %vm417_vm2, %v585_v36, 0 }
 0x251   : > { %599 = vmatpush.bf16.msra.mxu1 %v590_v38 }
 0x252   : > { %v574_v39 = vmul.f32 1.442695, %v573_v37 }
 0x254   : > { %887 = vpow2.f32 %v574_v39  ;;  %408 = vadd.xlane.f32.xlu1 %v407_v40 }
 0x25a   : > { %v888_v42 = vpop.eup %887 }
 0x25b   : > { %v580_v43 = vpack.c.bf16 %v888_v42, %v888_v42  ;;  %785 = vmatmul.msk.bf16.vlgmr.msra.gmra.mxu3 %vm400_vm3, %v525_v41  ;;  %v576_v44 = vsel %vm400_vm3, %v888_v42, 0.0 }
 0x25c   : > { %577 = vadd.xlane.f32.xlu1 %v576_v44 }
 0x25d   : > { %787 = vmatmul.msk.bf16.vlgmr.msra.gmra.mxu1 %vm400_vm3, %v580_v43 }
 0x2bc   : > { %v523_v50 = vpop.xlane.xlu2 %522 }
 0x2bf   : > { %v466_v45 = vpop.xlane.xlu1 %465 }
 0x2c7   : > { %v409_v47 = vpop.xlane.xlu1 %408 }
 0x2c8   : > { %889 = vrcp.f32 %v409_v47 }
 0x2c9   : > { %891 = vrcp.f32 %v466_v45 }
 0x2ca   : > { %v486_v46 = vpop.f32.mrf.mxu1  ;;  %893 = vrcp.f32 %v523_v50 }
 0x2ce   : > { %v430_v48 = vpop.f32.mrf.mxu3  ;;  %v890_v53 = vpop.eup %889 }
 0x2cf   : > { %v578_v52 = vpop.xlane.xlu1 %577  ;;  %v434_v55 = vmul.f32 %v890_v53, %v430_v48  ;;  %v892_v56 = vpop.eup %891 }
 0x2d0   : > { %895 = vrcp.f32 %v578_v52  ;;  %v490_v57 = vmul.f32 %v892_v56, %v486_v46  ;;  %v894_v58 = vpop.eup %893 }
 0x2d2   : > { %v488_v49 = vpop.f32.mrf.mxu1  ;;  %v491_v60 = vadd.f32 %v490_v57, %v434_v55 }
 0x2d6   : > { %v432_v51 = vpop.f32.mrf.mxu3  ;;  %v896_v62 = vpop.eup %895 }
 0x2da   : > { %v601_v54 = vpop.f32.mrf.mxu1 }
 0x2db   : > { %v605_v63 = vmul.f32 %v896_v62, %v601_v54 }
 0x2de   : > { %v541_v59 = vpop.f32.mrf.mxu3 }
 0x2df   : > { %v545_v61 = vmul.f32 %v894_v58, %v541_v59 }
 0x2e1   : > { %v546_v0 = vadd.f32 %v545_v61, %v491_v60 }
 0x2e2   : > { %v603_v2 = vpop.f32.mrf.mxu1 }
 0x2e3   : > { %v606_v3 = vadd.f32 %v605_v63, %v546_v0 }
 0x2e5   : > { %v610_v4 = vadd.f32 %v880_v1, %v606_v3 }
 0x2e6   : > { %v543_v5 = vpop.f32.mrf.mxu3 }
 0x2e7   : > { %611 = vst.msk [vmem:[%s245_s22] sm:$0xff] %vm328_vm0, %v610_v4 }
 0x2e8   : > { %1014 = shalt.err (!%p1011_p9)
}
 0x2e9   : > { %814 = dma.vmem_to_hbm [thread:$0]  (%p1164_p4), %s626_s27, 128, %s628_s28, %s613_s23  }
 0x2ea PF: > { %s639_s14 = sand.u32 1, %s1045_s15   ;;  %p1289_p10 = scmp.ge.s32.totalorder %s1057_s18, 2 }
 0x2eb   : > { %s640_s10 = scalar_lea.sflag [#allocation4], %s639_s14 }
 0x2ec   : > { %p828_p13 = pnand %p1289_p10, %p1168_p6 }
 0x2ee   : > { %p829_p11 = pneg %p828_p13 }
 0x2f0   : > { %1040 = dma.done.wait (%p829_p11), %s640_s10, 128  }
 0x2f1   : > { %1042 = vsyncadd (%p829_p11), %s640_s10, 4294967168  ;;  %p18_p0 = scmp.ge.s32.totalorder %s1138_s8, 4   ;;  %s1290_s15 = smov %s1049_s16 }
 0x2f2   : > { %s1291_s16 = smov %s1053_s17  ;;  %s1292_s17 = smov %s1149_s11 }
 0x2f3   : > { %s1293_s18 = smov %s1138_s8  ;;  %20 = sbr.rel (!%p18_p0) target bundleno = 6 (0x6), region = 89 }
 0x2f8   :  { %646 = vsyncpa [#allocation3], 1 }
 0x2f9   :  { %648 = vsyncpa [#allocation3 + $0x1], 1 }
 0x2fa   :  { %649 = vsyncpa [#allocation6], 1 }
 0x2fb   :  { %650 = vsyncpa [#allocation4], 1 }
 0x2fc   :  { %652 = vsyncpa [#allocation4 + $0x1], 1 }

</bundles_post_ra>
